<compile_context>
chip_gen: v7x
topology: tpu7x:2x2x1
jax: 0.10.0
libtpu: 0.0.40
codegen_flags: <defaults>
</compile_context>

<pallas_src>
import functools

import jax
import jax.numpy as jnp
from jax import lax
from jax.experimental import pallas as pl
from jax.experimental.pallas import tpu as pltpu


def _round_up(x, m):
    return (x + m - 1) // m * m


def stacking_fcn_kernel(x_ref, w1_ref, shift_ref, w2_ref, b2_ref, out_ref, *, wp):
    # x_ref    : (N, Cin_p, L)     zero-padded images, spatial flattened row-major
    # w1_ref   : (F, 9*Cin_p)      BN-folded 3x3 conv weight, K order = (dy, dx, c)
    # shift_ref: (F, 1)            folded conv bias + BN shift
    # w2_ref   : (C, F)            1x1 conv weight
    # b2_ref   : (C, 1)            1x1 conv bias
    # out_ref  : (N, C, H*Wp)      per-pixel logits (Wp = W+2; last 2 cols junk)
    n_batch = x_ref.shape[0]
    hwp = out_ref.shape[2]

    w1 = w1_ref[...]
    shift = shift_ref[...]
    w2 = w2_ref[...]
    b2 = b2_ref[...]

    for n in range(n_batch):                       # N is tiny & static -> unrolled
        xn = x_ref[n]                              # (Cin_p, L), lane-dense
        # 9 shifted views of the flattened padded image (static lane shifts),
        # stacked along sublanes -> one (9*Cin_p, H*Wp) im2col operand.
        taps = []
        for dy in range(3):
            for dx in range(3):
                s = dy * wp + dx
                taps.append(xn[:, s:s + hwp])      # (Cin_p, hwp)
        patches = jnp.concatenate(taps, axis=0)    # (9*Cin_p, hwp)

        # 3x3 conv + folded BatchNorm + ReLU: one MXU matmul, then add + max.
        hidden = jnp.dot(w1, patches, preferred_element_type=jnp.float32)
        hidden = jnp.maximum(hidden + shift, 0.0)  # (F, hwp)

        # Final 1x1 conv == per-pixel matmul.
        logits = jnp.dot(w2, hidden, preferred_element_type=jnp.float32) + b2
        out_ref[n] = logits.astype(out_ref.dtype)  # (C, hwp)


def stacking_fcn_forward(x_nchw, w1, b1, gamma, beta, run_mean, run_var,
                         w2, b2, eps=1e-4):
    """x_nchw: (N, Cin, H, W) float32. Returns (N, num_classes, H, W) float32."""
    N, Cin, H, W = x_nchw.shape
    F = w1.shape[3]
    C = w2.shape[1]
    Hp, Wp = H + 2, W + 2
    HWp = H * Wp
    Cin_p = _round_up(Cin, 8)                      # sublane-aligned channel count
    L = _round_up(2 * Wp + 2 + HWp, 128)           # lane-dense flattened length

    # Fold eval-mode BatchNorm into the conv weight + a single additive shift.
    scale = gamma / jnp.sqrt(run_var + eps)                               # (F,)
    shift_f = (b1 * scale + beta - run_mean * scale).reshape(F, 1)        # (F,1)
    w1t = jnp.transpose(w1, (3, 0, 1, 2)) * scale[:, None, None, None]    # (F,3,3,Cin)
    w1t = jnp.pad(w1t, ((0, 0), (0, 0), (0, 0), (0, Cin_p - Cin)))
    w1f = w1t.reshape(F, 9 * Cin_p)                                       # (F, 9*Cin_p)
    w2f = jnp.transpose(w2, (1, 0))                                       # (C, F)
    b2f = b2.reshape(C, 1)

    # NCHW is already channels-major: zero-pad H/W by 1 (conv padding=1), pad
    # channels to Cin_p, flatten spatial row-major, pad tail to L lanes.
    x_pad = jnp.pad(x_nchw, ((0, 0), (0, Cin_p - Cin), (1, 1), (1, 1)))
    x_flat = x_pad.reshape(N, Cin_p, Hp * Wp)
    x_flat = jnp.pad(x_flat, ((0, 0), (0, 0), (0, L - Hp * Wp)))

    kernel = functools.partial(stacking_fcn_kernel, wp=Wp)
    out_flat = pl.pallas_call(
        kernel,
        out_shape=jax.ShapeDtypeStruct((N, C, HWp), jnp.float32),
        grid=(1,),                                # whole batch in one grid step
        in_specs=[
            pl.BlockSpec((N, Cin_p, L), lambda i: (0, 0, 0)),
            pl.BlockSpec((F, 9 * Cin_p), lambda i: (0, 0)),
            pl.BlockSpec((F, 1), lambda i: (0, 0)),
            pl.BlockSpec((C, F), lambda i: (0, 0)),
            pl.BlockSpec((C, 1), lambda i: (0, 0)),
        ],
        out_specs=pl.BlockSpec((N, C, HWp), lambda i: (0, 0, 0)),
        compiler_params=pltpu.CompilerParams(
            dimension_semantics=("arbitrary",)),
    )(x_flat, w1f, shift_f, w2f, b2f)

    # (N, C, H*Wp) -> (N, C, H, Wp); drop the 2 junk columns per image row.
    return out_flat.reshape(N, C, H, Wp)[:, :, :, :W]


def reference_forward(x_nchw, w1, b1, gamma, beta, run_mean, run_var,
                      w2, b2, eps=1e-4):
    """Plain-JAX reference (lax conv) for sanity checking."""
    x_nhwc = jnp.transpose(x_nchw, (0, 2, 3, 1))
    y = lax.conv_general_dilated(
        x_nhwc, w1, window_strides=(1, 1), padding=((1, 1), (1, 1)),
        dimension_numbers=('NHWC', 'HWIO', 'NHWC')) + b1
    scale = gamma / jnp.sqrt(run_var + eps)
    shift = beta - run_mean * scale
    y = jnp.maximum(y * scale + shift, 0.0)
    y = jnp.einsum('nhwf,fc->nhwc', y, w2) + b2
    return jnp.transpose(y, (0, 3, 1, 2))


if __name__ == "__main__":
    # StackingFCN(input_model_nr=4, num_classes=2, filter_nr=32)
    N, Cin, H, W = 2, 4, 16, 16
    F_NR, NUM_CLASSES = 32, 2

    key = jax.random.PRNGKey(0)
    kx, kw1, kb1, kg, kb, km, kv, kw2, kb2 = jax.random.split(key, 9)

    x = jax.random.normal(kx, (N, Cin, H, W), jnp.float32)

    # Deterministic synthetic parameters (shapes per module __init__).
    w1 = jax.random.normal(kw1, (3, 3, Cin, F_NR), jnp.float32) * 0.1    # HWIO
    b1 = jax.random.normal(kb1, (F_NR,), jnp.float32) * 0.1
    gamma = 1.0 + 0.1 * jax.random.normal(kg, (F_NR,), jnp.float32)
    beta = 0.1 * jax.random.normal(kb, (F_NR,), jnp.float32)
    run_mean = 0.1 * jax.random.normal(km, (F_NR,), jnp.float32)
    run_var = jnp.abs(jax.random.normal(kv, (F_NR,), jnp.float32)) + 0.5
    w2 = jax.random.normal(kw2, (F_NR, NUM_CLASSES), jnp.float32) * 0.1  # 1x1 conv
    b2 = jax.random.normal(kb2, (NUM_CLASSES,), jnp.float32) * 0.1

    out = stacking_fcn_forward(x, w1, b1, gamma, beta, run_mean, run_var, w2, b2)
    out = jax.block_until_ready(out)

    ref = jax.block_until_ready(
        reference_forward(x, w1, b1, gamma, beta, run_mean, run_var, w2, b2))
    assert out.shape == (N, NUM_CLASSES, H, W)
    assert jnp.allclose(out, ref, atol=1e-4, rtol=1e-4), \
        float(jnp.max(jnp.abs(out - ref)))

    print("KERNEL_OK")
</pallas_src>

<mosaic_0001>
module attributes {stable_mosaic.version = 11 : i64} {
  func.func @stacking_fcn_kernel(%arg0: i32, %arg1: memref<2x8x384xf32, #tpu.memory_space<vmem>>, %arg2: memref<32x72xf32, #tpu.memory_space<vmem>>, %arg3: memref<32x1xf32, #tpu.memory_space<vmem>>, %arg4: memref<2x32xf32, #tpu.memory_space<vmem>>, %arg5: memref<2x1xf32, #tpu.memory_space<vmem>>, %arg6: memref<2x2x288xf32, #tpu.memory_space<vmem>>) attributes {dimension_semantics = [#tpu.dimension_semantics<arbitrary>], iteration_bounds = array<i64: 1>, scalar_prefetch = 0 : i64, scratch_operands = 0 : i64, tpu.core_type = #tpu.core_type<tc>, window_params = [{pipeline_mode = #tpu.pipeline_mode<synchronous>, transform_indices = @transform_0, window_bounds = array<i64: 2, 8, 384>}, {pipeline_mode = #tpu.pipeline_mode<synchronous>, transform_indices = @transform_1, window_bounds = array<i64: 32, 72>}, {pipeline_mode = #tpu.pipeline_mode<synchronous>, transform_indices = @transform_2, window_bounds = array<i64: 32, 1>}, {pipeline_mode = #tpu.pipeline_mode<synchronous>, transform_indices = @transform_3, window_bounds = array<i64: 2, 32>}, {pipeline_mode = #tpu.pipeline_mode<synchronous>, transform_indices = @transform_4, window_bounds = array<i64: 2, 1>}, {pipeline_mode = #tpu.pipeline_mode<synchronous>, transform_indices = @transform_5, window_bounds = array<i64: 2, 2, 288>}]} {
    %c0 = arith.constant 0 : index
    %c0_0 = arith.constant 0 : index
    %0 = vector.load %arg2[%c0, %c0_0] : memref<32x72xf32, #tpu.memory_space<vmem>>, vector<32x72xf32>
    %c0_1 = arith.constant 0 : index
    %c0_2 = arith.constant 0 : index
    %1 = vector.load %arg3[%c0_1, %c0_2] : memref<32x1xf32, #tpu.memory_space<vmem>>, vector<32x1xf32>
    %c0_3 = arith.constant 0 : index
    %c0_4 = arith.constant 0 : index
    %2 = vector.load %arg4[%c0_3, %c0_4] : memref<2x32xf32, #tpu.memory_space<vmem>>, vector<2x32xf32>
    %c0_5 = arith.constant 0 : index
    %c0_6 = arith.constant 0 : index
    %3 = vector.load %arg5[%c0_5, %c0_6] : memref<2x1xf32, #tpu.memory_space<vmem>>, vector<2x1xf32>
    %c0_7 = arith.constant 0 : index
    %c0_8 = arith.constant 0 : index
    %c0_9 = arith.constant 0 : index
    %4 = vector.load %arg1[%c0_7, %c0_8, %c0_9] : memref<2x8x384xf32, #tpu.memory_space<vmem>>, vector<1x8x384xf32>
    %5 = vector.shape_cast %4 : vector<1x8x384xf32> to vector<8x384xf32>
    %6 = vector.extract_strided_slice %5 {offsets = [0, 0], sizes = [8, 288], strides = [1, 1]} : vector<8x384xf32> to vector<8x288xf32>
    %7 = vector.extract_strided_slice %5 {offsets = [0, 1], sizes = [8, 288], strides = [1, 1]} : vector<8x384xf32> to vector<8x288xf32>
    %8 = vector.extract_strided_slice %5 {offsets = [0, 2], sizes = [8, 288], strides = [1, 1]} : vector<8x384xf32> to vector<8x288xf32>
    %9 = vector.extract_strided_slice %5 {offsets = [0, 18], sizes = [8, 288], strides = [1, 1]} : vector<8x384xf32> to vector<8x288xf32>
    %10 = vector.extract_strided_slice %5 {offsets = [0, 19], sizes = [8, 288], strides = [1, 1]} : vector<8x384xf32> to vector<8x288xf32>
    %11 = vector.extract_strided_slice %5 {offsets = [0, 20], sizes = [8, 288], strides = [1, 1]} : vector<8x384xf32> to vector<8x288xf32>
    %12 = vector.extract_strided_slice %5 {offsets = [0, 36], sizes = [8, 288], strides = [1, 1]} : vector<8x384xf32> to vector<8x288xf32>
    %13 = vector.extract_strided_slice %5 {offsets = [0, 37], sizes = [8, 288], strides = [1, 1]} : vector<8x384xf32> to vector<8x288xf32>
    %14 = vector.extract_strided_slice %5 {offsets = [0, 38], sizes = [8, 288], strides = [1, 1]} : vector<8x384xf32> to vector<8x288xf32>
    %15 = tpu.concatenate %6, %7, %8, %9, %10, %11, %12, %13, %14 in 0 : vector<8x288xf32>, vector<8x288xf32>, vector<8x288xf32>, vector<8x288xf32>, vector<8x288xf32>, vector<8x288xf32>, vector<8x288xf32>, vector<8x288xf32>, vector<8x288xf32> -> vector<72x288xf32>
    %cst = arith.constant dense<0.000000e+00> : vector<32x288xf32>
    %16 = tpu.matmul %0, %15, %cst {dimension_numbers = #tpu.dot_dimension_numbers<[1], [0], [0], [1], [0, 0, 1, 1], [], []>} : vector<32x72xf32>, vector<72x288xf32>, vector<32x288xf32> -> vector<32x288xf32>
    %17 = vector.broadcast %1 : vector<32x1xf32> to vector<32x288xf32>
    %18 = arith.addf %16, %17 : vector<32x288xf32>
    %cst_10 = arith.constant 0.000000e+00 : f32
    %19 = vector.broadcast %cst_10 : f32 to vector<32x288xf32>
    %20 = arith.maximumf %18, %19 : vector<32x288xf32>
    %cst_11 = arith.constant dense<0.000000e+00> : vector<2x288xf32>
    %21 = tpu.matmul %2, %20, %cst_11 {dimension_numbers = #tpu.dot_dimension_numbers<[1], [0], [0], [1], [0, 0, 1, 1], [], []>} : vector<2x32xf32>, vector<32x288xf32>, vector<2x288xf32> -> vector<2x288xf32>
    %22 = vector.broadcast %3 : vector<2x1xf32> to vector<2x288xf32>
    %23 = arith.addf %21, %22 : vector<2x288xf32>
    %c0_12 = arith.constant 0 : index
    %c0_13 = arith.constant 0 : index
    %c0_14 = arith.constant 0 : index
    %24 = vector.load %arg6[%c0_12, %c0_13, %c0_14] : memref<2x2x288xf32, #tpu.memory_space<vmem>>, vector<1x2x288xf32>
    %25 = vector.shape_cast %24 : vector<1x2x288xf32> to vector<2x288xf32>
    %26 = vector.shape_cast %23 : vector<2x288xf32> to vector<1x2x288xf32>
    tpu.vector_store %arg6[%c0_12, %c0_13, %c0_14], %26 {strides = array<i32>} : memref<2x2x288xf32, #tpu.memory_space<vmem>>, vector<1x2x288xf32>,
    %c1 = arith.constant 1 : index
    %c0_15 = arith.constant 0 : index
    %c0_16 = arith.constant 0 : index
    %27 = vector.load %arg1[%c1, %c0_15, %c0_16] : memref<2x8x384xf32, #tpu.memory_space<vmem>>, vector<1x8x384xf32>
    %28 = vector.shape_cast %27 : vector<1x8x384xf32> to vector<8x384xf32>
    %29 = vector.extract_strided_slice %28 {offsets = [0, 0], sizes = [8, 288], strides = [1, 1]} : vector<8x384xf32> to vector<8x288xf32>
    %30 = vector.extract_strided_slice %28 {offsets = [0, 1], sizes = [8, 288], strides = [1, 1]} : vector<8x384xf32> to vector<8x288xf32>
    %31 = vector.extract_strided_slice %28 {offsets = [0, 2], sizes = [8, 288], strides = [1, 1]} : vector<8x384xf32> to vector<8x288xf32>
    %32 = vector.extract_strided_slice %28 {offsets = [0, 18], sizes = [8, 288], strides = [1, 1]} : vector<8x384xf32> to vector<8x288xf32>
    %33 = vector.extract_strided_slice %28 {offsets = [0, 19], sizes = [8, 288], strides = [1, 1]} : vector<8x384xf32> to vector<8x288xf32>
    %34 = vector.extract_strided_slice %28 {offsets = [0, 20], sizes = [8, 288], strides = [1, 1]} : vector<8x384xf32> to vector<8x288xf32>
    %35 = vector.extract_strided_slice %28 {offsets = [0, 36], sizes = [8, 288], strides = [1, 1]} : vector<8x384xf32> to vector<8x288xf32>
    %36 = vector.extract_strided_slice %28 {offsets = [0, 37], sizes = [8, 288], strides = [1, 1]} : vector<8x384xf32> to vector<8x288xf32>
    %37 = vector.extract_strided_slice %28 {offsets = [0, 38], sizes = [8, 288], strides = [1, 1]} : vector<8x384xf32> to vector<8x288xf32>
    %38 = tpu.concatenate %29, %30, %31, %32, %33, %34, %35, %36, %37 in 0 : vector<8x288xf32>, vector<8x288xf32>, vector<8x288xf32>, vector<8x288xf32>, vector<8x288xf32>, vector<8x288xf32>, vector<8x288xf32>, vector<8x288xf32>, vector<8x288xf32> -> vector<72x288xf32>
    %cst_17 = arith.constant dense<0.000000e+00> : vector<32x288xf32>
    %39 = tpu.matmul %0, %38, %cst_17 {dimension_numbers = #tpu.dot_dimension_numbers<[1], [0], [0], [1], [0, 0, 1, 1], [], []>} : vector<32x72xf32>, vector<72x288xf32>, vector<32x288xf32> -> vector<32x288xf32>
    %40 = vector.broadcast %1 : vector<32x1xf32> to vector<32x288xf32>
    %41 = arith.addf %39, %40 : vector<32x288xf32>
    %cst_18 = arith.constant 0.000000e+00 : f32
    %42 = vector.broadcast %cst_18 : f32 to vector<32x288xf32>
    %43 = arith.maximumf %41, %42 : vector<32x288xf32>
    %cst_19 = arith.constant dense<0.000000e+00> : vector<2x288xf32>
    %44 = tpu.matmul %2, %43, %cst_19 {dimension_numbers = #tpu.dot_dimension_numbers<[1], [0], [0], [1], [0, 0, 1, 1], [], []>} : vector<2x32xf32>, vector<32x288xf32>, vector<2x288xf32> -> vector<2x288xf32>
    %45 = vector.broadcast %3 : vector<2x1xf32> to vector<2x288xf32>
    %46 = arith.addf %44, %45 : vector<2x288xf32>
    %c1_20 = arith.constant 1 : index
    %c0_21 = arith.constant 0 : index
    %c0_22 = arith.constant 0 : index
    %47 = vector.load %arg6[%c1_20, %c0_21, %c0_22] : memref<2x2x288xf32, #tpu.memory_space<vmem>>, vector<1x2x288xf32>
    %48 = vector.shape_cast %47 : vector<1x2x288xf32> to vector<2x288xf32>
    %49 = vector.shape_cast %46 : vector<2x288xf32> to vector<1x2x288xf32>
    tpu.vector_store %arg6[%c1_20, %c0_21, %c0_22], %49 {strides = array<i32>} : memref<2x2x288xf32, #tpu.memory_space<vmem>>, vector<1x2x288xf32>,
    return
  }
  func.func @transform_0(%arg0: i32) -> (i32, i32, i32) {
    %c0_i32 = arith.constant 0 : i32
    %c0_i32_0 = arith.constant 0 : i32
    %c0_i32_1 = arith.constant 0 : i32
    %c0_i32_2 = arith.constant 0 : i32
    return %c0_i32, %c0_i32_0, %c0_i32_1 : i32, i32, i32
  }
  func.func @transform_1(%arg0: i32) -> (i32, i32) {
    %c0_i32 = arith.constant 0 : i32
    %c0_i32_0 = arith.constant 0 : i32
    %c0_i32_1 = arith.constant 0 : i32
    return %c0_i32, %c0_i32_0 : i32, i32
  }
  func.func @transform_2(%arg0: i32) -> (i32, i32) {
    %c0_i32 = arith.constant 0 : i32
    %c0_i32_0 = arith.constant 0 : i32
    %c0_i32_1 = arith.constant 0 : i32
    return %c0_i32, %c0_i32_0 : i32, i32
  }
  func.func @transform_3(%arg0: i32) -> (i32, i32) {
    %c0_i32 = arith.constant 0 : i32
    %c0_i32_0 = arith.constant 0 : i32
    %c0_i32_1 = arith.constant 0 : i32
    return %c0_i32, %c0_i32_0 : i32, i32
  }
  func.func @transform_4(%arg0: i32) -> (i32, i32) {
    %c0_i32 = arith.constant 0 : i32
    %c0_i32_0 = arith.constant 0 : i32
    %c0_i32_1 = arith.constant 0 : i32
    return %c0_i32, %c0_i32_0 : i32, i32
  }
  func.func @transform_5(%arg0: i32) -> (i32, i32, i32) {
    %c0_i32 = arith.constant 0 : i32
    %c0_i32_0 = arith.constant 0 : i32
    %c0_i32_1 = arith.constant 0 : i32
    %c0_i32_2 = arith.constant 0 : i32
    return %c0_i32, %c0_i32_0, %c0_i32_1 : i32, i32, i32
  }
}

</mosaic_0001>

<bundles_post_ra>
// kernel: tpu_custom_call.1
= control target key start
LH: loop header
LB: loop body
LE: loop exit
PB: predicated region body
PF: predicated region fallthrough
CT: control target
= control target key end

     0   :  { %10 = vsyncpa [#allocation3], 0  ;;  %s1748_s0 = inlined_call_operand.hbm [shape: f32[2,8,384], index: 0, kind: input, shape index: {}]   ;;  %s1749_s1 = inlined_call_operand.vmem [shape: f32[32,72], index: 1, kind: input, shape index: {}]   ;;  %s1750_s2 = inlined_call_operand.vmem [shape: f32[32,1], index: 2, kind: input, shape index: {}]   ;;  %s1751_s3 = inlined_call_operand.vmem [shape: f32[2,32], index: 3, kind: input, shape index: {}]   ;;  %s1752_s4 = inlined_call_operand.vmem [shape: f32[2,1], index: 4, kind: input, shape index: {}]   ;;  %s1753_s5 = inlined_call_operand.hbm [shape: f32[2,2,288], index: 5, kind: output, shape index: {}]  }
   0x1   :  { %11 = vsyncpa [#allocation4], 0  ;;  %s1360_s18 = smov [#allocation2]   ;;  %s1312_s22 = scalar_lea.hbm %s1748_s0, 768 }
   0x2   :  { %s17_s19 = sshll.u32 %s1360_s18, 4  ;;  %p1313_p0 = scmp.ne.s32.totalorder %s1748_s0, %s1312_s22  ;;  %s18_s19 = int_to_ptr.vmem [resolvable:$true] %s17_s19 }
   0x3   :  { %p1316_p1 = scmp.lt.u32.totalorder %s1312_s22, %s1748_s0 }
   0x5   :  { %p1318_p2 = pnand %p1316_p1, %p1313_p0 }
   0x7   :  { %1321 = shalt.err (!%p1318_p2)
}
   0x8   :  { %s1322_s27 = scalar_lea.vmem %s18_s19, 768  ;;  %p1327_p4 = scmp.lt.s32.totalorder %s18_s19, %s18_s19 }
   0x9   :  { %p1323_p3 = scmp.ne.s32.totalorder %s18_s19, %s1322_s27  ;;  %p1328_p5 = scmp.lt.s32.totalorder %s1322_s27, %s1322_s27 }
   0xb   :  { %p1329_p6 = por %p1328_p5, %p1327_p4 }
   0xd   :  { %p1330_p7 = pnand %p1329_p6, %p1323_p3 }
   0xf   :  { %1333 = shalt.err (!%p1330_p7)
}
  0x10   :  { %s1361_s28 = smov 384   ;;  %s1362_s29 = smov 24  }
  0x11   :  { %23 = dma.hbm_to_vmem [thread:$0]  %s1748_s0, 768, %s18_s19, [#allocation3], %s1361_s28, %s1361_s28, %s1362_s29  }
  0x12   :  { %1356 = dma.done.wait [#allocation3], 768  }
  0x13   :  { %1357 = vsyncadd [#allocation3], 4294966528  ;;  %v1421_v0 = vld [vmem:[#allocation2 + $0x8] sm:$0xff]  ;;  %v1423_v1 = vld [vmem:[#allocation2 + $0x10] sm:$0xff]  ;;  %s1363_s7 = smov 126   ;;  %s1364_s8 = smov 127  }
  0x14   :  { %v1245_v2 = vpack.i.bf16 %v1423_v1, %v1421_v0  ;;  %v1429_v3 = vld [vmem:[#allocation2] sm:$0xff]  ;;  %s1365_s9 = smov 110   ;;  %s1366_s0 = smov 108   ;;  %vm167_vm0 = vcmask 588800   ;;  %v1370_v5 = vmov 0.0   ;;  %v1372_v7 = vmov 0  }
  0x15   :  { %s1367_s10 = smov 109   ;;  %v1443_v4 = vld [vmem:[%s1749_s1] sm:$0xff]  ;;  %s1368_s13 = smov 91   ;;  %244 = vmatprep.mubr.f32.mxu0 %v1370_v5  ;;  %1275 = vset.pattern.permute.xlu1 %v1372_v7  ;;  %v1469_v9 = vld [vmem:[#allocation2 + $0x28] sm:$0xff]  ;;  %v41_v11 = vld [vmem:[%s1750_s2 + $0x10] sm:$0xff]  ;;  %vm57_vm1 = vcmask 1039360  }
  0x16   :  { %1246 = vrot.lane.b32.xlu1 %v1245_v2, %s1363_s7  ;;  %1241 = vrot.lane.b32.xlu0 %v1245_v2, %s1364_s8  ;;  %s1369_s14 = smov 92   ;;  %s1371_s15 = smov 90   ;;  %v39_v6 = vld [vmem:[%s1750_s2] sm:$0xff]  ;;  %v40_v10 = vld [vmem:[%s1750_s2 + $0x8] sm:$0xff]  ;;  %v1483_v14 = vld [vmem:[#allocation2 + $0x18] sm:$0xff]  ;;  %vm81_vm2 = vcmask 900096  }
  0x17   :  { %1077 = vmatprep.mubr.msk.f32.mxu1 %vm167_vm0, %v1443_v4  ;;  %1276 = vset.pattern.permute.xlu0 %v1372_v7  ;;  %v1467_v8 = vld [vmem:[#allocation2 + $0x20] sm:$0xff]  ;;  %v42_v13 = vld [vmem:[%s1750_s2 + $0x18] sm:$0xff]  ;;  %vm69_vm3 = vcmask 1031168   ;;  %vm105_vm4 = vcmask 883712   ;;  %vm93_vm5 = vcmask 891904   ;;  %vm129_vm6 = vcmask 744448  }
  0x18   :  { %v1277_v12 = vpack.i.bf16 %v1469_v9, %v1467_v8  ;;  %v44_v15 = vld [vmem:[%s1752_s4] sm:$0x3]  ;;  %vm117_vm7 = vcmask 752640   ;;  %vm141_vm8 = vcmask 736256   ;;  %vm1374_vm9 = vmmov 0  }
  0x19   :  { %vm371_vm10 = vcmask 261120   ;;  %vm536_vm11 = vcmask 1041408   ;;  %vm537_vm12 = vcmask 1043458   ;;  %vm539_vm14 = vcmask 259076  }
  0x1a   :  { %1251 = vrot.lane.b32.xlu1 %v1245_v2, %s1365_s9  ;;  %51 = vrot.lane.b32.xlu0 %v1429_v3, %s1364_s8  ;;  %vm538_vm13 = vmor %vm537_vm12, %vm536_vm11 }
  0x1b   :  { %vm1708_vm15 = vmor %vm539_vm14, %vm538_vm13 }
  0x1e   :  { %75 = vrot.lane.b32.xlu1 %v1429_v3, %s1365_s9  ;;  %63 = vrot.lane.b32.xlu0 %v1429_v3, %s1363_s7 }
  0x22   :  { %1261 = vrot.lane.b32.xlu1 %v1245_v2, %s1366_s0  ;;  %1256 = vrot.lane.b32.xlu0 %v1245_v2, %s1367_s10 }
  0x26   :  { %99 = vrot.lane.b32.xlu1 %v1429_v3, %s1366_s0  ;;  %87 = vrot.lane.b32.xlu0 %v1429_v3, %s1367_s10 }
  0x2a   :  { %1271 = vrot.lane.b32.xlu1 %v1245_v2, %s1368_s13  ;;  %1266 = vrot.lane.b32.xlu0 %v1245_v2, %s1369_s14 }
  0x2e   :  { %123 = vrot.lane.b32.xlu1 %v1429_v3, %s1368_s13  ;;  %111 = vrot.lane.b32.xlu0 %v1429_v3, %s1369_s14 }
  0x32   :  { %139 = vrot.lane.b32.xlu1 %v1423_v1, %s1371_s15  ;;  %137 = vrot.lane.b32.xlu0 %v1421_v0, %s1371_s15 }
  0x36   :  { %135 = vrot.lane.b32.xlu0 %v1429_v3, %s1371_s15  ;;  %149 = vperm.xlu1 %1275, %v39_v6  }
  0x3a   :  { %154 = vperm.xlu0 %1276, %v40_v10   ;;  %159 = vperm.xlu1 %1275, %v41_v11  }
  0x3e   :  { %1278 = vrot.lane.b32.xlu0 %v1277_v12, %s1364_s8  ;;  %164 = vperm.xlu1 %1275, %v42_v13  }
  0x42   :  { %1283 = vrot.lane.b32.xlu0 %v1277_v12, %s1363_s7  ;;  %549 = vrot.lane.b32.xlu1 %v1483_v14, %s1364_s8 }
  0x46   :  { %560 = vrot.lane.b32.xlu0 %v1483_v14, %s1363_s7  ;;  %1288 = vrot.lane.b32.xlu1 %v1277_v12, %s1365_s9 }
  0x4a   :  { %1293 = vrot.lane.b32.xlu0 %v1277_v12, %s1367_s10  ;;  %571 = vrot.lane.b32.xlu1 %v1483_v14, %s1365_s9 }
  0x4e   :  { %582 = vrot.lane.b32.xlu0 %v1483_v14, %s1367_s10  ;;  %1298 = vrot.lane.b32.xlu1 %v1277_v12, %s1366_s0 }
  0x52   :  { %1303 = vrot.lane.b32.xlu0 %v1277_v12, %s1369_s14  ;;  %593 = vrot.lane.b32.xlu1 %v1483_v14, %s1366_s0 }
  0x56   :  { %604 = vrot.lane.b32.xlu0 %v1483_v14, %s1369_s14  ;;  %1308 = vrot.lane.b32.xlu1 %v1277_v12, %s1368_s13  ;;  %v1534_v12 = vld [vmem:[%s1749_s1 + $0x8] sm:$0xff] }
  0x5a   :  { %628 = vrot.lane.b32.xlu0 %v1467_v8, %s1371_s15  ;;  %615 = vrot.lane.b32.xlu1 %v1483_v14, %s1368_s13 }
  0x5e   :  { %626 = vrot.lane.b32.xlu0 %v1483_v14, %s1371_s15  ;;  %630 = vrot.lane.b32.xlu1 %v1469_v9, %s1371_s15 }
  0x62   :  { %368 = vperm.xlu1 %1275, %v44_v15   ;;  %v1540_v15 = vld [vmem:[%s1749_s1 + $0x10] sm:$0xff] }
  0x88   :  { %v1247_v16 = vpop.permute.xlu1 %1246  ;;  %v1242_v17 = vpop.permute.xlu0 %1241 }
  0x89   :  { %v1244_v18 = vunpack.i.h.bf16 %v1242_v17  ;;  %v1243_v19 = vunpack.i.l.bf16 %v1242_v17  ;;  %v1249_v20 = vunpack.i.h.bf16 %v1247_v16  ;;  %v1248_v21 = vunpack.i.l.bf16 %v1247_v16  ;;  %v1549_v17 = vld [vmem:[%s1749_s1 + $0x18] sm:$0xff] }
  0x8b   :  { %v1145_v22 = vpack.c.bf16 %v1244_v18, %v1423_v1  ;;  %v59_v23 = vsel %vm57_vm1, %v1243_v19, %v1244_v18  ;;  %v71_v32 = vsel %vm69_vm3, %v1248_v21, %v1249_v20 }
  0x8c   :  { %v1252_v24 = vpop.permute.xlu1 %1251  ;;  %v52_v25 = vpop.permute.xlu0 %51  ;;  %v1129_v26 = vpack.c.bf16 %v59_v23, %v1421_v0 }
  0x8d   :  { %v1254_v27 = vunpack.i.h.bf16 %v1252_v24  ;;  %v1253_v28 = vunpack.i.l.bf16 %v1252_v24  ;;  %v58_v29 = vsel %vm57_vm1, %v52_v25, %v1243_v19  ;;  %1146 = vmatprep.subr.bf16.mxu1 %v1145_v22  ;;  %v1373_v19 = vmov 0.0|0.0  }
  0x8e   :  { %1130 = vmatprep.subr.bf16.mxu0 %v1129_v26  ;;  %1148 = vmatpush3.bf16.msra.mxu1 %v1145_v22  ;;  %v1131_v30 = vpack.c.bf16 %v58_v29, %v1429_v3 }
  0x8f   :  { %v1149_v31 = vpack.c.bf16 %v1254_v27, %v1249_v20  ;;  %v83_v33 = vsel %vm81_vm2, %v1253_v28, %v1254_v27 }
  0x90   :  { %v76_v34 = vpop.permute.xlu1 %75  ;;  %1132 = vmatpush1.bf16.msra.mxu0 %v1131_v30  ;;  %v64_v35 = vpop.permute.xlu0 %63  ;;  %v1133_v36 = vpack.c.bf16 %v83_v33, %v71_v32 }
  0x91   :  { %v82_v37 = vsel %vm81_vm2, %v76_v34, %v1253_v28  ;;  %v70_v38 = vsel %vm69_vm3, %v64_v35, %v1248_v21  ;;  %1150 = vmatprep.subr.bf16.mxu1 %v1149_v31 }
  0x92   :  { %v1135_v39 = vpack.c.bf16 %v82_v37, %v70_v38  ;;  %1134 = vmatprep.subr.bf16.mxu0 %v1133_v36  ;;  %1152 = vmatpush3.bf16.msra.mxu1 %v1149_v31 }
  0x94   :  { %v1262_v40 = vpop.permute.xlu1 %1261  ;;  %1136 = vmatpush1.bf16.msra.mxu0 %v1135_v39  ;;  %v1257_v41 = vpop.permute.xlu0 %1256 }
  0x95   :  { %v1264_v42 = vunpack.i.h.bf16 %v1262_v40  ;;  %v1263_v43 = vunpack.i.l.bf16 %v1262_v40  ;;  %v1259_v44 = vunpack.i.h.bf16 %v1257_v41  ;;  %v1258_v45 = vunpack.i.l.bf16 %v1257_v41 }
  0x97   :  { %v1153_v46 = vpack.c.bf16 %v1264_v42, %v1259_v44  ;;  %v95_v47 = vsel %vm93_vm5, %v1258_v45, %v1259_v44  ;;  %v107_v48 = vsel %vm105_vm4, %v1263_v43, %v1264_v42 }
  0x98   :  { %v100_v49 = vpop.permute.xlu1 %99  ;;  %v88_v50 = vpop.permute.xlu0 %87  ;;  %v1137_v51 = vpack.c.bf16 %v107_v48, %v95_v47 }
  0x99   :  { %v106_v52 = vsel %vm105_vm4, %v100_v49, %v1263_v43  ;;  %v94_v53 = vsel %vm93_vm5, %v88_v50, %v1258_v45  ;;  %1154 = vmatprep.subr.bf16.mxu1 %v1153_v46 }
  0x9a   :  { %v1139_v54 = vpack.c.bf16 %v106_v52, %v94_v53  ;;  %1138 = vmatprep.subr.bf16.mxu0 %v1137_v51  ;;  %1156 = vmatpush3.bf16.msra.mxu1 %v1153_v46 }
  0x9c   :  { %v1272_v55 = vpop.permute.xlu1 %1271  ;;  %v1267_v56 = vpop.permute.xlu0 %1266  ;;  %1140 = vmatpush1.bf16.msra.mxu0 %v1139_v54 }
  0x9d   :  { %v1274_v57 = vunpack.i.h.bf16 %v1272_v55  ;;  %v1273_v58 = vunpack.i.l.bf16 %v1272_v55  ;;  %v1269_v59 = vunpack.i.h.bf16 %v1267_v56  ;;  %v1268_v60 = vunpack.i.l.bf16 %v1267_v56 }
  0x9f   :  { %v1157_v61 = vpack.c.bf16 %v1274_v57, %v1269_v59  ;;  %v119_v62 = vsel %vm117_vm7, %v1268_v60, %v1269_v59  ;;  %v131_v63 = vsel %vm129_vm6, %v1273_v58, %v1274_v57 }
  0xa0   :  { %v124_v0 = vpop.permute.xlu1 %123  ;;  %v112_v1 = vpop.permute.xlu0 %111  ;;  %v1141_v2 = vpack.c.bf16 %v131_v63, %v119_v62 }
  0xa1   :  { %v130_v3 = vsel %vm129_vm6, %v124_v0, %v1273_v58  ;;  %v118_v6 = vsel %vm117_vm7, %v112_v1, %v1268_v60  ;;  %1158 = vmatprep.subr.bf16.mxu1 %v1157_v61 }
  0xa2   :  { %v1143_v7 = vpack.c.bf16 %v130_v3, %v118_v6  ;;  %1142 = vmatprep.subr.bf16.mxu0 %v1141_v2  ;;  %1160 = vmatpush3.bf16.msra.mxu1 %v1157_v61 }
  0xa4   :  { %v140_v10 = vpop.permute.xlu1 %139  ;;  %v138_v11 = vpop.permute.xlu0 %137  ;;  %1144 = vmatpush1.bf16.msra.mxu0 %v1143_v7 }
  0xa5   :  { %1075 = vmatprep.subr.mxu1 %v140_v10  ;;  %v143_v13 = vsel %vm141_vm8, %v138_v11, %v140_v10 }
  0xa6   :  { %196 = vmatprep.subr.mxu0 %v143_v13  ;;  %1076 = vmatpush3.msra.mxu1 %v140_v10 }
  0xa7   :  { %1078 = vmatmul.mubr.msk.f32.vlgmr.msra.gmra.mrb[0].mxu1 %vm167_vm0, %v1534_v12 }
  0xa8   :  { %v136_v16 = vpop.permute.xlu0 %135  ;;  %1080 = vmatprep.mubr.msk.f32.mxu1 %vm167_vm0, %v1540_v15 }
  0xa9   :  { %v142_v18 = vsel %vm141_vm8, %v136_v16, %v138_v11 }
  0xaa   :  { %197 = vmatpush1.msra.mxu0 %v142_v18 }
  0xab   :  { %1003 = vmatmul.mubr.msk.f32.vlgmr.msra.gmra.mrb[0].mxu0 %vm167_vm0, %v1443_v4  ;;  %1081 = vmatmul.mubr.msk.f32.gmra.mrb[2].mxu1 %vm167_vm0, %v1549_v17 }
  0xac   :  { %250 = vmatprep.mubr.f32.mxu0 %v1370_v5  ;;  %439 = vmatprep.mubr.f32.mxu1 %v1370_v5 }
  0xad   :  { %1169 = vmatprep.subr.bf16.mxu0 %v1373_v19 }
  0xaf   :  { %1004 = vmatmul.mubr.msk.f32.gmra.mrb[2].mxu0 %vm167_vm0, %v1534_v12 }
  0xb0   :  { %256 = vmatprep.mubr.f32.mxu0 %v1370_v5 }
  0xb3   :  { %1005 = vmatmul.mubr.msk.f32.gmra.mrb[4].mxu0 %vm167_vm0, %v1540_v15 }
  0xb4   :  { %262 = vmatprep.mubr.f32.mxu0 %v1370_v5 }
  0xb5   :  { %v1569_v20 = vpop.permute.xlu1 %149 }
  0xb7   :  { %1006 = vmatmul.mubr.msk.f32.gmra.mrb[6].mxu0 %vm167_vm0, %v1549_v17 }
  0xb8   :  { %1091 = vmatprep.mubr.msk.f32.mxu0 %vm1374_vm9, %v1370_v5 }
  0xb9   :  { %v1571_v21 = vpop.permute.xlu1 %159  ;;  %v1573_v22 = vpop.permute.xlu0 %154 }
  0xbd   :  { %v1575_v23 = vpop.permute.xlu1 %164  ;;  %v1577_v24 = vpop.permute.xlu0 %1278 }
  0xbe   :  { %v1281_v40 = vunpack.i.h.bf16 %v1577_v24 }
  0xc0   :  { %v1191_v54 = vpack.c.bf16 %v1281_v40, %v1469_v9  ;;  %v1615_v9 = vld [vmem:[%s1751_s3] sm:$0x3]  ;;  %s1376_s3 = smov [#allocation5]  }
  0xc1   :  { %v1579_v25 = vpop.permute.xlu1 %549  ;;  %v1581_v26 = vpop.permute.xlu0 %1283  ;;  %s991_s6 = sshll.u32 %s1376_s3, 4  ;;  %s992_s6 = int_to_ptr.vmem [resolvable:$true] %s991_s6 }
  0xc2   :  { %v1286_v55 = vunpack.i.h.bf16 %v1581_v26  ;;  %s1334_s7 = scalar_lea.vmem %s992_s6, 192  ;;  %p1339_p9 = scmp.lt.s32.totalorder %s992_s6, %s992_s6 }
  0xc3   :  { %p1335_p8 = scmp.ne.s32.totalorder %s992_s6, %s1334_s7  ;;  %p1340_p10 = scmp.lt.s32.totalorder %s1334_s7, %s1334_s7 }
  0xc5   :  { %v1583_v27 = vpop.permute.xlu1 %1288  ;;  %v1585_v28 = vpop.permute.xlu0 %560  ;;  %p1341_p11 = por %p1340_p10, %p1339_p9 }
  0xc6   :  { %v1291_v52 = vunpack.i.h.bf16 %v1583_v27 }
  0xc7   :  { %p1342_p12 = pnand %p1341_p11, %p1335_p8 }
  0xc8   :  { %v1195_v2 = vpack.c.bf16 %v1291_v52, %v1286_v55 }
  0xc9   :  { %v1587_v29 = vpop.permute.xlu1 %571  ;;  %v1591_v34 = vpop.permute.xlu0 %1293 }
  0xca   :  { %v1296_v7 = vunpack.i.h.bf16 %v1591_v34 }
  0xcd   :  { %v1593_v35 = vpop.permute.xlu1 %1298  ;;  %v1600_v51 = vpop.permute.xlu0 %582 }
  0xce   :  { %v1301_v1 = vunpack.i.h.bf16 %v1593_v35 }
  0xd1   :  { %v1603_v53 = vpop.permute.xlu1 %593  ;;  %v1621_v11 = vpop.permute.xlu0 %1303 }
  0xd5   :  { %v1623_v13 = vpop.permute.xlu1 %1308 }
  0xd6   :  { %v1311_v18 = vunpack.i.h.bf16 %v1623_v13 }
 0x17a   :  { %v1079_v30 = vpop.f32.mrb[0].mxu1 }
 0x17b   :  { %v341_v31 = vadd.f32 %v1079_v30, %v1573_v22  ;;  %v335_v32 = vpop.f32.mrb[1].mxu1 }
 0x17c   :  { %v336_v33 = vadd.f32 %v335_v32, %v1569_v20  ;;  %v1280_v32 = vunpack.i.l.bf16 %v1577_v24 }
 0x17d   :  { %v359_v36 = vmax.f32 %v341_v31, 0.0 }
 0x17e   :  { %v356_v37 = vmax.f32 %v336_v33, 0.0  ;;  %v246_v38 = vpop.f32.mrb[0].mxu0  ;;  %v1082_v39 = vpop.f32.mrb[2].mxu1  ;;  %v1199_v33 = vpack.c.bf16 %v1301_v1, %v1296_v7 }
 0x17f   :  { %v351_v41 = vadd.f32 %v1082_v39, %v1575_v23  ;;  %v248_v42 = vpop.f32.mrb[1].mxu0  ;;  %v345_v43 = vpop.f32.mrb[3].mxu1  ;;  %v247_v46 = vadd.f32 %v246_v38, %v1569_v20  ;;  %v1306_v38 = vunpack.i.h.bf16 %v1621_v11 }
 0x180   :  { %v1170_v44 = vpack.c.bf16 %v359_v36, %v356_v37  ;;  %v346_v45 = vadd.f32 %v345_v43, %v1571_v21  ;;  %v249_v48 = vadd.f32 %v248_v42, %v1569_v20  ;;  %v1290_v43 = vunpack.i.l.bf16 %v1583_v27 }
 0x181   :  { %v365_v47 = vmax.f32 %v351_v41, 0.0  ;;  %v354_v60 = vmax.f32 %v247_v46, 0.0  ;;  %v1285_v46 = vunpack.i.l.bf16 %v1581_v26  ;;  %v1295_v26 = vunpack.i.l.bf16 %v1591_v34 }
 0x182   :  { %v362_v49 = vmax.f32 %v346_v45, 0.0  ;;  %v252_v50 = vpop.f32.mrb[2].mxu0  ;;  %1171 = vmatpush3.bf16.msra.mxu0 %v1170_v44  ;;  %v355_v62 = vmax.f32 %v249_v48, 0.0  ;;  %v1203_v48 = vpack.c.bf16 %v1311_v18, %v1306_v38  ;;  %v578_v24 = vsel %vm81_vm2, %v1290_v43, %v1291_v52  ;;  %v605_v52 = vpop.permute.xlu0 %604 }
 0x183   :  { %v253_v56 = vadd.f32 %v252_v50, %v1573_v22  ;;  %v254_v57 = vpop.f32.mrb[3].mxu0  ;;  %1172 = vmatprep.subr.bf16.mxu0 %v1373_v19  ;;  %v616_v50 = vpop.permute.xlu1 %615  ;;  %v566_v34 = vsel %vm69_vm3, %v1585_v28, %v1285_v46 }
 0x184   :  { %v1173_v58 = vpack.c.bf16 %v365_v47, %v362_v49  ;;  %v255_v59 = vadd.f32 %v254_v57, %v1573_v22  ;;  %v556_v49 = vsel %vm57_vm1, %v1280_v32, %v1281_v40  ;;  %v1310_v40 = vunpack.i.l.bf16 %v1623_v13 }
 0x185   :  { %v357_v61 = vmax.f32 %v253_v56, 0.0  ;;  %v555_v56 = vsel %vm57_vm1, %v1579_v25, %v1280_v32  ;;  %v1175_v57 = vpack.c.bf16 %v556_v49, %v1467_v8  ;;  %v577_v8 = vsel %vm81_vm2, %v1587_v29, %v1290_v43 }
 0x186   :  { %v358_v63 = vmax.f32 %v255_v59, 0.0  ;;  %v258_v0 = vpop.f32.mrb[4].mxu0  ;;  %1174 = vmatpush3.bf16.msra.mxu0 %v1173_v58  ;;  %v1300_v58 = vunpack.i.l.bf16 %v1593_v35  ;;  %v567_v59 = vsel %vm69_vm3, %v1285_v46, %v1286_v55  ;;  %v1177_v25 = vpack.c.bf16 %v555_v56, %v1483_v14 }
 0x187   :  { %v1163_v3 = vpack.c.bf16 %v357_v61, %v354_v60  ;;  %v260_v6 = vpop.f32.mrb[5].mxu0  ;;  %1192 = vmatprep.subr.bf16.mxu0 %v1191_v54  ;;  %v259_v16 = vadd.f32 %v258_v0, %v1571_v21  ;;  %v1305_v60 = vunpack.i.l.bf16 %v1621_v11  ;;  %v631_v61 = vpop.permute.xlu1 %630  ;;  %v1179_v27 = vpack.c.bf16 %v578_v24, %v567_v59 }
 0x188   :  { %v1161_v10 = vpack.c.bf16 %v358_v63, %v355_v62  ;;  %v261_v30 = vadd.f32 %v260_v6, %v1571_v21  ;;  %v589_v55 = vsel %vm93_vm5, %v1295_v26, %v1296_v7  ;;  %v600_v14 = vsel %vm105_vm4, %v1300_v58, %v1301_v1 }
 0x189   :  { %1092 = vmatmul.mubr.msk.f32.vlgmr.msra.gmra.mrb[8].mxu0 %vm371_vm10, %v1615_v9  ;;  %v360_v41 = vmax.f32 %v259_v16, 0.0  ;;  %v1181_v29 = vpack.c.bf16 %v577_v8, %v566_v34  ;;  %v611_v28 = vsel %vm117_vm7, %v1305_v60, %v1306_v38  ;;  %v622_v62 = vsel %vm129_vm6, %v1310_v40, %v1311_v18 }
 0x18a   :  { %v264_v31 = vpop.f32.mrb[6].mxu0  ;;  %1162 = vmatprep.subr.bf16.mxu1 %v1161_v10  ;;  %1194 = vmatpush3.bf16.msra.mxu0 %v1191_v54  ;;  %v361_v44 = vmax.f32 %v261_v30, 0.0  ;;  %v599_v63 = vsel %vm105_vm4, %v1603_v53, %v1300_v58  ;;  %v588_v0 = vsel %vm93_vm5, %v1600_v51, %v1295_v26  ;;  %v1187_v35 = vpack.c.bf16 %v622_v62, %v611_v28 }
 0x18b   :  { %v265_v36 = vadd.f32 %v264_v31, %v1575_v23  ;;  %v266_v37 = vpop.f32.mrb[7].mxu0  ;;  %1164 = vmatpush1.bf16.msra.mxu1 %v1163_v3  ;;  %1196 = vmatprep.subr.bf16.mxu0 %v1195_v2  ;;  %v1185_v1 = vpack.c.bf16 %v599_v63, %v588_v0  ;;  %v629_v3 = vpop.permute.xlu0 %628  ;;  %v621_v6 = vsel %vm129_vm6, %v616_v50, %v1310_v40  ;;  %v1375_v16 = vmov 1983009808  }
 0x18c   :  { %v267_v39 = vadd.f32 %v266_v37, %v1575_v23  ;;  %1112 = vmatprep.mubr.msk.f32.mxu0 %vm167_vm0, %v1443_v4  ;;  %v610_v53 = vsel %vm117_vm7, %v605_v52, %v1305_v60  ;;  %v633_v7 = vsel %vm141_vm8, %v629_v3, %v631_v61  ;;  %v521_v18 = vunpack.c.l.s4 %v1375_v16  ;;  %v1697_v32 = vpop.permute.xlu1 %368 }
 0x18d   :  { %v363_v42 = vmax.f32 %v265_v36, 0.0  ;;  %v1189_v51 = vpack.c.bf16 %v621_v6, %v610_v53  ;;  %v523_v30 = vlaneseq }
 0x18e   :  { %v364_v45 = vmax.f32 %v267_v39, 0.0  ;;  %1198 = vmatpush3.bf16.msra.mxu0 %v1195_v2  ;;  %v1183_v2 = vpack.c.bf16 %v600_v14, %v589_v55  ;;  %v522_v31 = vunpack.c.0.s8 %v521_v18 }
 0x18f   :  { %v1167_v47 = vpack.c.bf16 %v363_v42, %v360_v41  ;;  %1200 = vmatprep.subr.bf16.mxu0 %v1199_v33  ;;  %v627_v10 = vpop.permute.xlu0 %626 }
 0x190   :  { %v1165_v54 = vpack.c.bf16 %v364_v45, %v361_v44  ;;  %v632_v11 = vsel %vm141_vm8, %v627_v10, %v629_v3 }
 0x192   :  { %1166 = vmatprep.subr.bf16.mxu1 %v1165_v54  ;;  %1202 = vmatpush3.bf16.msra.mxu0 %v1199_v33 }
 0x193   :  { %1168 = vmatpush1.bf16.msra.mxu1 %v1167_v47  ;;  %1204 = vmatprep.subr.bf16.mxu0 %v1203_v48 }
 0x194   :  { %1176 = vmatprep.subr.bf16.mxu1 %v1175_v57 }
 0x196   :  { %1011 = vmatmul.mubr.msk.f32.vlgmr.msra.gmra.mrb[4].mxu1 %vm371_vm10, %v1615_v9  ;;  %1206 = vmatpush3.bf16.msra.mxu0 %v1203_v48 }
 0x197   :  { %1178 = vmatpush1.bf16.msra.mxu1 %v1177_v25  ;;  %1110 = vmatprep.subr.mxu0 %v631_v61 }
 0x198   :  { %1180 = vmatprep.subr.bf16.mxu1 %v1179_v27  ;;  %701 = vmatprep.mubr.f32.mxu1 %v1370_v5 }
 0x19a   :  { %1111 = vmatpush3.msra.mxu0 %v631_v61 }
 0x19b   :  { %1182 = vmatpush1.bf16.msra.mxu1 %v1181_v29  ;;  %1113 = vmatmul.mubr.msk.f32.vlgmr.msra.gmra.mrb[10].mxu0 %vm167_vm0, %v1534_v12 }
 0x19c   :  { %1184 = vmatprep.subr.bf16.mxu1 %v1183_v2  ;;  %1115 = vmatprep.mubr.msk.f32.mxu0 %vm167_vm0, %v1540_v15 }
 0x19f   :  { %1186 = vmatpush1.bf16.msra.mxu1 %v1185_v1  ;;  %1116 = vmatmul.mubr.msk.f32.gmra.mrb[12].mxu0 %vm167_vm0, %v1549_v17 }
 0x1a0   :  { %1188 = vmatprep.subr.bf16.mxu1 %v1187_v35  ;;  %887 = vmatprep.mubr.f32.mxu0 %v1370_v5 }
 0x1a3   :  { %1190 = vmatpush1.bf16.msra.mxu1 %v1189_v51 }
 0x1a4   :  { %653 = vmatprep.subr.mxu1 %v633_v7 }
 0x1a7   :  { %654 = vmatpush1.msra.mxu1 %v632_v11 }
 0x1a8   :  { %1013 = vmatmul.mubr.msk.f32.vlgmr.msra.gmra.mrb[6].mxu1 %vm167_vm0, %v1443_v4  ;;  %1215 = vmatprep.subr.bf16.mxu1 %v1373_v19 }
 0x1a9   :  { %707 = vmatprep.mubr.f32.mxu1 %v1370_v5 }
 0x1ac   :  { %1014 = vmatmul.mubr.msk.f32.gmra.mrb[8].mxu1 %vm167_vm0, %v1534_v12  ;;  %v524_v12 = vshrl.u32 %v523_v30, 7 }
 0x1ad   :  { %713 = vmatprep.mubr.f32.mxu1 %v1370_v5 }
 0x1ae   :  { %v1701_v37 = vsub.s32 %v522_v31, %v524_v12 }
 0x1b0   :  { %1015 = vmatmul.mubr.msk.f32.gmra.mrb[10].mxu1 %vm167_vm0, %v1540_v15 }
 0x1b1   :  { %719 = vmatprep.mubr.f32.mxu1 %v1370_v5 }
 0x1b4   :  { %1016 = vmatmul.mubr.msk.f32.gmra.mrb[12].mxu1 %vm167_vm0, %v1549_v17 }
 0x1b5   :  { %1126 = vmatprep.mubr.msk.f32.mxu1 %vm1374_vm9, %v1370_v5 }
 0x25c   :  { %v512_v4 = vpop.f32.mrb[8].mxu0 }
 0x25d   :  { %v1093_v13 = vpop.f32.mrb[9].mxu0  ;;  %v513_v17 = vadd.f32 %v512_v4, %v1697_v32 }
 0x25f   :  { %v533_v41 = vrot.slane %v513_v17, %v1701_v37 }
 0x269   :  { %v441_v33 = vpop.f32.mrb[4].mxu1 }
 0x26a   :  { %v442_v15 = vadd.f32 %v441_v33, %v1697_v32  ;;  %v443_v36 = vpop.f32.mrb[5].mxu1 }
 0x26b   :  { %v444_v5 = vadd.f32 %v443_v36, %v1697_v32 }
 0x26d   :  { %v519_v38 = vcombine.low %v442_v15, %v444_v5 }
 0x26e   :  { %v1114_v39 = vpop.f32.mrb[10].mxu0 }
 0x26f   :  { %v526_v42 = vrot.slane %v519_v38, %v1701_v37  ;;  %v798_v43 = vadd.f32 %v1114_v39, %v1573_v22  ;;  %v792_v44 = vpop.f32.mrb[11].mxu0 }
 0x270   :  { %v793_v45 = vadd.f32 %v792_v44, %v1569_v20 }
 0x271   :  { %v534_v47 = vcombine.low %v526_v42, %v533_v41  ;;  %v816_v48 = vmax.f32 %v798_v43, 0.0 }
 0x272   :  { %v813_v49 = vmax.f32 %v793_v45, 0.0  ;;  %v1117_v50 = vpop.f32.mrb[12].mxu0 }
 0x273   :  { %v808_v54 = vadd.f32 %v1117_v50, %v1575_v23  ;;  %v802_v56 = vpop.f32.mrb[13].mxu0  ;;  %541 = vst.msk [vmem:[#allocation5] sm:$0x3f] %vm1708_vm15, %v534_v47 }
 0x274   :  { %v1216_v57 = vpack.c.bf16 %v816_v48, %v813_v49  ;;  %v803_v58 = vadd.f32 %v802_v56, %v1571_v21 }
 0x275   :  { %v822_v26 = vmax.f32 %v808_v54, 0.0 }
 0x276   :  { %v819_v59 = vmax.f32 %v803_v58, 0.0  ;;  %1217 = vmatpush3.bf16.msra.mxu1 %v1216_v57 }
 0x277   :  { %1218 = vmatprep.subr.bf16.mxu1 %v1373_v19 }
 0x278   :  { %v1219_v24 = vpack.c.bf16 %v822_v26, %v819_v59 }
 0x27a   :  { %1220 = vmatpush3.bf16.msra.mxu1 %v1219_v24 }
 0x27b   :  { %v703_v40 = vpop.f32.mrb[6].mxu1 }
 0x27c   :  { %v705_v25 = vpop.f32.mrb[7].mxu1  ;;  %v704_v60 = vadd.f32 %v703_v40, %v1569_v20 }
 0x27d   :  { %1127 = vmatmul.mubr.msk.f32.vlgmr.msra.gmra.mrb[14].mxu1 %vm371_vm10, %v1615_v9  ;;  %v706_v8 = vadd.f32 %v705_v25, %v1569_v20 }
 0x27e   :  { %v811_v55 = vmax.f32 %v704_v60, 0.0 }
 0x27f   :  { %v709_v61 = vpop.f32.mrb[8].mxu1  ;;  %v812_v19 = vmax.f32 %v706_v8, 0.0 }
 0x280   :  { %v710_v34 = vadd.f32 %v709_v61, %v1573_v22  ;;  %v711_v27 = vpop.f32.mrb[9].mxu1 }
 0x281   :  { %v712_v52 = vadd.f32 %v711_v27, %v1573_v22 }
 0x282   :  { %v814_v14 = vmax.f32 %v710_v34, 0.0 }
 0x283   :  { %v815_v29 = vmax.f32 %v712_v52, 0.0  ;;  %v715_v28 = vpop.f32.mrb[10].mxu1 }
 0x284   :  { %v1209_v62 = vpack.c.bf16 %v814_v14, %v811_v55  ;;  %v717_v63 = vpop.f32.mrb[11].mxu1  ;;  %v716_v2 = vadd.f32 %v715_v28, %v1571_v21 }
 0x285   :  { %v1207_v0 = vpack.c.bf16 %v815_v29, %v812_v19  ;;  %v718_v35 = vadd.f32 %v717_v63, %v1571_v21 }
 0x286   :  { %v817_v6 = vmax.f32 %v716_v2, 0.0 }
 0x287   :  { %v721_v1 = vpop.f32.mrb[12].mxu1  ;;  %1208 = vmatprep.subr.bf16.mxu0 %v1207_v0  ;;  %v818_v51 = vmax.f32 %v718_v35, 0.0 }
 0x288   :  { %v722_v20 = vadd.f32 %v721_v1, %v1575_v23  ;;  %v723_v3 = vpop.f32.mrb[13].mxu1  ;;  %1210 = vmatpush1.bf16.msra.mxu0 %v1209_v62 }
 0x289   :  { %v724_v22 = vadd.f32 %v723_v3, %v1575_v23 }
 0x28a   :  { %v820_v53 = vmax.f32 %v722_v20, 0.0 }
 0x28b   :  { %v821_v7 = vmax.f32 %v724_v22, 0.0 }
 0x28c   :  { %v1213_v10 = vpack.c.bf16 %v820_v53, %v817_v6 }
 0x28d   :  { %v1211_v11 = vpack.c.bf16 %v821_v7, %v818_v51 }
 0x28f   :  { %1212 = vmatprep.subr.bf16.mxu0 %v1211_v11 }
 0x290   :  { %1214 = vmatpush1.bf16.msra.mxu0 %v1213_v10 }
 0x293   :  { %1021 = vmatmul.mubr.msk.f32.vlgmr.msra.gmra.mrb[14].mxu0 %vm371_vm10, %v1615_v9 }
 0x350   :  { %v960_v21 = vpop.f32.mrb[14].mxu1 }
 0x351   :  { %v1128_v4 = vpop.f32.mrb[15].mxu1  ;;  %v961_v30 = vadd.f32 %v960_v21, %v1697_v32 }
 0x353   :  { %v981_v12 = vrot.slane %v961_v30, %v1701_v37 }
 0x366   :  { %v889_v13 = vpop.f32.mrb[14].mxu0 }
 0x367   :  { %v890_v16 = vadd.f32 %v889_v13, %v1697_v32  ;;  %v891_v18 = vpop.f32.mrb[15].mxu0 }
 0x368   :  { %v892_v23 = vadd.f32 %v891_v18, %v1697_v32 }
 0x36a   :  { %v967_v31 = vcombine.low %v890_v16, %v892_v23 }
 0x36c   :  { %v974_v33 = vrot.slane %v967_v31, %v1701_v37 }
 0x36e   :  { %v982_v15 = vcombine.low %v974_v33, %v981_v12 }
 0x370   :  { %985 = vst.msk [vmem:[#allocation5 + $0x6] sm:$0x3f] %vm1708_vm15, %v982_v15 }
 0x371   :  { %1345 = shalt.err (!%p1342_p12)
}
 0x372   :  { %s1346_s0 = scalar_lea.hbm %s1753_s5, 192 }
 0x373   :  { %p1347_p13 = scmp.ne.s32.totalorder %s1753_s5, %s1346_s0  ;;  %p1350_p0 = scmp.lt.u32.totalorder %s1346_s0, %s1753_s5 }
 0x375   :  { %p1352_p1 = pnand %p1350_p0, %p1347_p13 }
 0x377   :  { %1355 = shalt.err (!%p1352_p1)
}
 0x378   :  { %s1377_s14 = smov 96   ;;  %s1378_s15 = smov 6  }
 0x379   :  { %997 = dma.vmem_to_hbm [thread:$0]  %s992_s6, 192, %s1753_s5, [#allocation4], %s1377_s14, %s1377_s14, %s1378_s15  }
 0x37a   :  { %1358 = dma.done.wait [#allocation4], 192  }
 0x37b   :  { %1359 = vsyncadd [#allocation4], 4294967104 }
 0x37c   :  { %1001 = vsyncpa [#allocation3], 1 }
 0x37d   :  { %1002 = vsyncpa [#allocation4], 1 }

</bundles_post_ra>
